<compile_context>
chip_gen: v7x
topology: tpu7x:2x2x1
jax: 0.10.0
libtpu: 0.0.40
codegen_flags: <defaults>
</compile_context>

<pallas_src>
import functools
import math

import jax
import jax.numpy as jnp
from jax.experimental import pallas as pl
from jax.experimental.pallas import tpu as pltpu


def _round_up(x: int, m: int) -> int:
    return ((x + m - 1) // m) * m


def _fused_mlp_kernel(*refs, num_layers: int):
    """Fused MLP forward for one batch tile, batch on the 128-lane axis.

    refs layout: (x_ref, w0, b0, w1, b1, ..., w_{L-1}, b_{L-1}, o_ref)
      x_ref : (d_in, tb)         activations, batch on lanes
      w_l   : (d_out_l, d_in_l)  PyTorch-native layout
      b_l   : (d_out_l, 1)       lane-broadcast bias
      o_ref : (d_out_last, tb)
    ReLU after every layer except the last (matches DQN.forward).
    """
    x_ref = refs[0]
    o_ref = refs[1 + 2 * num_layers]

    h = x_ref[...].astype(jnp.float32)                     # (d_in, tb)
    for layer in range(num_layers):
        w_ref = refs[1 + 2 * layer]
        b_ref = refs[2 + 2 * layer]
        h = jnp.dot(w_ref[...], h, preferred_element_type=jnp.float32)
        h = h + b_ref[...]                                 # (d_out, 1) broadcast
        if layer < num_layers - 1:
            h = jnp.maximum(h, 0.0)                        # ReLU, hidden only
    o_ref[...] = h.astype(o_ref.dtype)


def dqn_forward(x: jax.Array, params, *, batch_tile: int = 1024) -> jax.Array:
    """Fused DQN forward: x [B, D_in] -> Q-values [B, D_out]."""
    B, d_in = x.shape
    num_layers = len(params)
    assert params[0][0].shape[1] == d_in
    d_out = params[-1][0].shape[0]

    # Batch tile (lane axis): either the full batch (single block, any size) or
    # a multiple of 128.  For B >= 256, cap at ~half the batch so the grid has
    # >= 2 "parallel" steps for v7x's two TensorCores; default cap 1024 keeps
    # per-step overhead amortized on v5e/v6e.  Ragged last tile -> Pallas
    # partial-block masking (no pad/slice wrapper ops).
    if B < 256:
        tb = B
    else:
        tb = min(_round_up(batch_tile, 128), _round_up(pl.cdiv(B, 2), 128))
    grid = (pl.cdiv(B, tb),)

    # Layout plumbing only: present a lane-dense [d_in, B] slab to the kernel.
    xT = x.T

    vmem = pltpu.MemorySpace.VMEM
    in_specs = [pl.BlockSpec((d_in, tb), lambda i: (0, i), memory_space=vmem)]
    for w, b in params:
        # Whole-array blocks, constant index_map: VMEM-resident across grid.
        in_specs.append(pl.BlockSpec(w.shape, lambda i: (0, 0), memory_space=vmem))
        in_specs.append(pl.BlockSpec(b.shape, lambda i: (0, 0), memory_space=vmem))
    out_spec = pl.BlockSpec((d_out, tb), lambda i: (0, i), memory_space=vmem)

    flops = 2 * B * sum(w.shape[0] * w.shape[1] for w, _ in params)
    bytes_accessed = (
        x.size * x.dtype.itemsize
        + sum(w.size * w.dtype.itemsize + b.size * b.dtype.itemsize for w, b in params)
        + B * d_out * x.dtype.itemsize
    )

    outT = pl.pallas_call(
        functools.partial(_fused_mlp_kernel, num_layers=num_layers),
        grid=grid,
        in_specs=in_specs,
        out_specs=out_spec,
        out_shape=jax.ShapeDtypeStruct((d_out, B), x.dtype),
        compiler_params=pltpu.CompilerParams(
            dimension_semantics=("parallel",)),
        cost_estimate=pl.CostEstimate(
            flops=flops, transcendentals=0, bytes_accessed=bytes_accessed),
    )(xT, *[p for wb in params for p in wb])

    return outT.T  # back to [B, d_out]


class DQNPallas:
    """JAX/Pallas equivalent of the PyTorch DQN module (fused forward)."""

    def __init__(self, layer_sizes, key):
        self.layer_sizes = list(layer_sizes)
        self.params = []
        for i in range(len(layer_sizes) - 1):
            fan_in, fan_out = layer_sizes[i], layer_sizes[i + 1]
            key, kw, kb = jax.random.split(key, 3)
            # Deterministic init mimicking torch.nn.Linear default:
            # U(-1/sqrt(fan_in), 1/sqrt(fan_in)); weight kept PyTorch-native
            # [fan_out, fan_in], bias [fan_out, 1].
            bound = 1.0 / math.sqrt(fan_in)
            w = jax.random.uniform(kw, (fan_out, fan_in), jnp.float32, -bound, bound)
            b = jax.random.uniform(kb, (fan_out, 1), jnp.float32, -bound, bound)
            self.params.append((w, b))

    def __call__(self, x: jax.Array) -> jax.Array:
        return dqn_forward(x, self.params)


def _reference_forward(x, params):
    """Pure-JAX reference for correctness checking."""
    h = x
    for i, (w, b) in enumerate(params):
        h = h @ w.T + b[:, 0]
        if i < len(params) - 1:
            h = jnp.maximum(h, 0.0)
    return h


if __name__ == "__main__":
    key = jax.random.PRNGKey(0)
    key, k_in = jax.random.split(key)

    # layer_sizes: input dim 4, two hidden layers of 32, output dim 2
    layer_sizes = [4, 32, 32, 2]
    batch = 2

    model = DQNPallas(layer_sizes, key)
    x = jax.random.normal(k_in, (batch, layer_sizes[0]), jnp.float32)

    out = jax.block_until_ready(model(x))
    assert out.shape == (batch, layer_sizes[-1]), out.shape

    ref = _reference_forward(x, model.params)
    assert jnp.allclose(out, ref, atol=1e-5, rtol=1e-5), (out, ref)

    print("KERNEL_OK")
</pallas_src>

<mosaic_0001>
module attributes {stable_mosaic.version = 11 : i64} {
  func.func @_fused_mlp_kernel(%arg0: i32, %arg1: memref<4x2xf32, #tpu.memory_space<vmem>>, %arg2: memref<32x4xf32, #tpu.memory_space<vmem>>, %arg3: memref<32x1xf32, #tpu.memory_space<vmem>>, %arg4: memref<32x32xf32, #tpu.memory_space<vmem>>, %arg5: memref<32x1xf32, #tpu.memory_space<vmem>>, %arg6: memref<2x32xf32, #tpu.memory_space<vmem>>, %arg7: memref<2x1xf32, #tpu.memory_space<vmem>>, %arg8: memref<2x2xf32, #tpu.memory_space<vmem>>) attributes {dimension_semantics = [#tpu.dimension_semantics<parallel>], iteration_bounds = array<i64: 1>, scalar_prefetch = 0 : i64, scratch_operands = 0 : i64, tpu.core_type = #tpu.core_type<tc>, window_params = [{transform_indices = @transform_0, window_bounds = array<i64: 4, 2>}, {pipeline_mode = #tpu.pipeline_mode<synchronous>, transform_indices = @transform_1, window_bounds = array<i64: 32, 4>}, {pipeline_mode = #tpu.pipeline_mode<synchronous>, transform_indices = @transform_2, window_bounds = array<i64: 32, 1>}, {pipeline_mode = #tpu.pipeline_mode<synchronous>, transform_indices = @transform_3, window_bounds = array<i64: 32, 32>}, {pipeline_mode = #tpu.pipeline_mode<synchronous>, transform_indices = @transform_4, window_bounds = array<i64: 32, 1>}, {pipeline_mode = #tpu.pipeline_mode<synchronous>, transform_indices = @transform_5, window_bounds = array<i64: 2, 32>}, {pipeline_mode = #tpu.pipeline_mode<synchronous>, transform_indices = @transform_6, window_bounds = array<i64: 2, 1>}, {transform_indices = @transform_7, window_bounds = array<i64: 2, 2>}]} {
    %c0 = arith.constant 0 : index
    %c0_0 = arith.constant 0 : index
    %0 = vector.load %arg1[%c0, %c0_0] : memref<4x2xf32, #tpu.memory_space<vmem>>, vector<4x2xf32>
    %c0_1 = arith.constant 0 : index
    %c0_2 = arith.constant 0 : index
    %1 = vector.load %arg2[%c0_1, %c0_2] : memref<32x4xf32, #tpu.memory_space<vmem>>, vector<32x4xf32>
    %cst = arith.constant dense<0.000000e+00> : vector<32x2xf32>
    %2 = tpu.matmul %1, %0, %cst {dimension_numbers = #tpu.dot_dimension_numbers<[1], [0], [0], [1], [0, 0, 1, 1], [], []>} : vector<32x4xf32>, vector<4x2xf32>, vector<32x2xf32> -> vector<32x2xf32>
    %c0_3 = arith.constant 0 : index
    %c0_4 = arith.constant 0 : index
    %3 = vector.load %arg3[%c0_3, %c0_4] : memref<32x1xf32, #tpu.memory_space<vmem>>, vector<32x1xf32>
    %4 = vector.broadcast %3 : vector<32x1xf32> to vector<32x2xf32>
    %5 = arith.addf %2, %4 : vector<32x2xf32>
    %cst_5 = arith.constant 0.000000e+00 : f32
    %6 = vector.broadcast %cst_5 : f32 to vector<32x2xf32>
    %7 = arith.maximumf %5, %6 : vector<32x2xf32>
    %c0_6 = arith.constant 0 : index
    %c0_7 = arith.constant 0 : index
    %8 = vector.load %arg4[%c0_6, %c0_7] : memref<32x32xf32, #tpu.memory_space<vmem>>, vector<32x32xf32>
    %cst_8 = arith.constant dense<0.000000e+00> : vector<32x2xf32>
    %9 = tpu.matmul %8, %7, %cst_8 {dimension_numbers = #tpu.dot_dimension_numbers<[1], [0], [0], [1], [0, 0, 1, 1], [], []>} : vector<32x32xf32>, vector<32x2xf32>, vector<32x2xf32> -> vector<32x2xf32>
    %c0_9 = arith.constant 0 : index
    %c0_10 = arith.constant 0 : index
    %10 = vector.load %arg5[%c0_9, %c0_10] : memref<32x1xf32, #tpu.memory_space<vmem>>, vector<32x1xf32>
    %11 = vector.broadcast %10 : vector<32x1xf32> to vector<32x2xf32>
    %12 = arith.addf %9, %11 : vector<32x2xf32>
    %cst_11 = arith.constant 0.000000e+00 : f32
    %13 = vector.broadcast %cst_11 : f32 to vector<32x2xf32>
    %14 = arith.maximumf %12, %13 : vector<32x2xf32>
    %c0_12 = arith.constant 0 : index
    %c0_13 = arith.constant 0 : index
    %15 = vector.load %arg6[%c0_12, %c0_13] : memref<2x32xf32, #tpu.memory_space<vmem>>, vector<2x32xf32>
    %cst_14 = arith.constant dense<0.000000e+00> : vector<2x2xf32>
    %16 = tpu.matmul %15, %14, %cst_14 {dimension_numbers = #tpu.dot_dimension_numbers<[1], [0], [0], [1], [0, 0, 1, 1], [], []>} : vector<2x32xf32>, vector<32x2xf32>, vector<2x2xf32> -> vector<2x2xf32>
    %c0_15 = arith.constant 0 : index
    %c0_16 = arith.constant 0 : index
    %17 = vector.load %arg7[%c0_15, %c0_16] : memref<2x1xf32, #tpu.memory_space<vmem>>, vector<2x1xf32>
    %18 = vector.broadcast %17 : vector<2x1xf32> to vector<2x2xf32>
    %19 = arith.addf %16, %18 : vector<2x2xf32>
    %c0_17 = arith.constant 0 : index
    %c0_18 = arith.constant 0 : index
    %20 = vector.load %arg8[%c0_17, %c0_18] : memref<2x2xf32, #tpu.memory_space<vmem>>, vector<2x2xf32>
    tpu.vector_store %arg8[%c0_17, %c0_18], %19 {strides = array<i32>} : memref<2x2xf32, #tpu.memory_space<vmem>>, vector<2x2xf32>,
    return
  }
  func.func @transform_0(%arg0: i32) -> (i32, i32) {
    %c0_i32 = arith.constant 0 : i32
    %c0_i32_0 = arith.constant 0 : i32
    return %c0_i32, %arg0 : i32, i32
  }
  func.func @transform_1(%arg0: i32) -> (i32, i32) {
    %c0_i32 = arith.constant 0 : i32
    %c0_i32_0 = arith.constant 0 : i32
    %c0_i32_1 = arith.constant 0 : i32
    return %c0_i32, %c0_i32_0 : i32, i32
  }
  func.func @transform_2(%arg0: i32) -> (i32, i32) {
    %c0_i32 = arith.constant 0 : i32
    %c0_i32_0 = arith.constant 0 : i32
    %c0_i32_1 = arith.constant 0 : i32
    return %c0_i32, %c0_i32_0 : i32, i32
  }
  func.func @transform_3(%arg0: i32) -> (i32, i32) {
    %c0_i32 = arith.constant 0 : i32
    %c0_i32_0 = arith.constant 0 : i32
    %c0_i32_1 = arith.constant 0 : i32
    return %c0_i32, %c0_i32_0 : i32, i32
  }
  func.func @transform_4(%arg0: i32) -> (i32, i32) {
    %c0_i32 = arith.constant 0 : i32
    %c0_i32_0 = arith.constant 0 : i32
    %c0_i32_1 = arith.constant 0 : i32
    return %c0_i32, %c0_i32_0 : i32, i32
  }
  func.func @transform_5(%arg0: i32) -> (i32, i32) {
    %c0_i32 = arith.constant 0 : i32
    %c0_i32_0 = arith.constant 0 : i32
    %c0_i32_1 = arith.constant 0 : i32
    return %c0_i32, %c0_i32_0 : i32, i32
  }
  func.func @transform_6(%arg0: i32) -> (i32, i32) {
    %c0_i32 = arith.constant 0 : i32
    %c0_i32_0 = arith.constant 0 : i32
    %c0_i32_1 = arith.constant 0 : i32
    return %c0_i32, %c0_i32_0 : i32, i32
  }
  func.func @transform_7(%arg0: i32) -> (i32, i32) {
    %c0_i32 = arith.constant 0 : i32
    %c0_i32_0 = arith.constant 0 : i32
    return %c0_i32, %arg0 : i32, i32
  }
}

</mosaic_0001>

<bundles_post_ra>
// kernel: tpu_custom_call.1
= control target key start
LH: loop header
LB: loop body
LE: loop exit
PB: predicated region body
PF: predicated region fallthrough
CT: control target
= control target key end

     0   :  { %vm69_vm0 = vcmask 1043456   ;;  %vm56_vm1 = vcmask 31744   ;;  %v494_v5 = vmov 0   ;;  %s617_s0 = inlined_call_operand.vmem [shape: f32[4,2], index: 0, kind: input, shape index: {}]   ;;  %s618_s1 = inlined_call_operand.vmem [shape: f32[32,4], index: 1, kind: input, shape index: {}]   ;;  %s619_s2 = inlined_call_operand.vmem [shape: f32[32,1], index: 2, kind: input, shape index: {}]   ;;  %s620_s3 = inlined_call_operand.vmem [shape: f32[32,32], index: 3, kind: input, shape index: {}]   ;;  %s621_s4 = inlined_call_operand.vmem [shape: f32[32,1], index: 4, kind: input, shape index: {}]   ;;  %s622_s5 = inlined_call_operand.vmem [shape: f32[2,32], index: 5, kind: input, shape index: {}]   ;;  %s623_s6 = inlined_call_operand.vmem [shape: f32[2,1], index: 6, kind: input, shape index: {}]   ;;  %s624_s7 = inlined_call_operand.hbm [shape: f32[2,2], index: 7, kind: output, shape index: {}]  }
   0x1   :  { %v27_v0 = vld [vmem:[%s617_s0] sm:$0xf]  ;;  %v29_v2 = vld [vmem:[%s618_s1 + $0x8] sm:$0xff]  ;;  %v30_v3 = vld [vmem:[%s618_s1 + $0x10] sm:$0xff]  ;;  %468 = vset.pattern.permute.xlu0 %v494_v5  ;;  %469 = vset.pattern.permute.xlu1 %v494_v5 }
   0x2   :  { %v28_v1 = vld [vmem:[%s618_s1] sm:$0xff]  ;;  %416 = vmatprep.subr.msk.mxu0 %vm69_vm0, %v27_v0  ;;  %v34_v6 = vld [vmem:[%s619_s2 + $0x10] sm:$0xff]  ;;  %v31_v7 = vld [vmem:[%s618_s1 + $0x18] sm:$0xff] }
   0x3   :  { %418 = vmatprep.mubr.msk.f32.mxu0 %vm56_vm1, %v28_v1  ;;  %v32_v4 = vld [vmem:[%s619_s2] sm:$0xff]  ;;  %417 = vmatpush3.msk.msra.mxu0 %vm69_vm0, %v27_v0  ;;  %v33_v8 = vld [vmem:[%s619_s2 + $0x8] sm:$0xff] }
   0x4   :  { %419 = vmatmul.mubr.msk.f32.vlgmr.msra.gmra.mrb[0].mxu0 %vm56_vm1, %v29_v2  ;;  %38 = vperm.xlu0 %468, %v32_v4  }
   0x5   :  { %421 = vmatprep.mubr.msk.f32.mxu0 %vm56_vm1, %v30_v3 }
   0x6   :  { %12 = vsyncpa [#allocation3], 0  ;;  %48 = vperm.xlu1 %469, %v34_v6   ;;  %v35_v9 = vld [vmem:[%s619_s2 + $0x18] sm:$0xff]  ;;  %v166_v10 = vld [vmem:[%s621_s4] sm:$0xff]  ;;  %vm190_vm2 = vcmask 261120   ;;  %v495_v37 = vmov 0.0|0.0  }
   0x7   :  { %v167_v11 = vld [vmem:[%s621_s4 + $0x8] sm:$0xff]  ;;  %v168_v12 = vld [vmem:[%s621_s4 + $0x10] sm:$0xff]  ;;  %v169_v13 = vld [vmem:[%s621_s4 + $0x18] sm:$0xff]  ;;  %457 = vmatprep.subr.bf16.mxu0 %v495_v37  ;;  %vm496_vm3 = vmmov 0   ;;  %v497_v38 = vmov 0.0   ;;  %s498_s10 = smov [#allocation2]  }
   0x8   :  { %422 = vmatmul.mubr.msk.f32.gmra.mrb[2].mxu0 %vm56_vm1, %v31_v7  ;;  %43 = vperm.xlu0 %468, %v33_v8   ;;  %v293_v14 = vld [vmem:[%s623_s6] sm:$0x3]  ;;  %v163_v34 = vld [vmem:[%s620_s3 + $0x8] sm:$0xff]  ;;  %v164_v35 = vld [vmem:[%s620_s3 + $0x10] sm:$0xff]  ;;  %s380_s0 = sshll.u32 %s498_s10, 4  ;;  %vm372_vm4 = vcmask 9216   ;;  %s381_s0 = int_to_ptr.vmem [resolvable:$true] %s380_s0 }
   0x9   :  { %v162_v15 = vld [vmem:[%s620_s3] sm:$0xff]  ;;  %v165_v36 = vld [vmem:[%s620_s3 + $0x18] sm:$0xff]  ;;  %446 = vmatprep.mubr.msk.f32.mxu0 %vm496_vm3, %v497_v38  ;;  %s470_s11 = scalar_lea.vmem %s381_s0, 32  ;;  %p475_p1 = scmp.lt.s32.totalorder %s381_s0, %s381_s0 }
   0xa   :  { %53 = vperm.xlu1 %469, %v35_v9   ;;  %432 = vmatprep.mubr.msk.f32.mxu1 %vm190_vm2, %v162_v15  ;;  %v292_v57 = vld [vmem:[%s622_s5] sm:$0x3]  ;;  %p471_p0 = scmp.ne.s32.totalorder %s381_s0, %s470_s11  ;;  %p476_p2 = scmp.lt.s32.totalorder %s470_s11, %s470_s11 }
   0xc   :  { %172 = vperm.xlu0 %468, %v166_v10   ;;  %p477_p3 = por %p476_p2, %p475_p1 }
   0xe   :  { %177 = vperm.xlu1 %469, %v167_v11   ;;  %p478_p4 = pnand %p477_p3, %p471_p0 }
  0x10   :  { %182 = vperm.xlu0 %468, %v168_v12  }
  0x12   :  { %187 = vperm.xlu1 %469, %v169_v13  }
  0x14   :  { %296 = vperm.xlu0 %468, %v293_v14  }
  0x83   :  { %v39_v16 = vpop.permute.xlu0 %38 }
  0x85   :  { %v49_v17 = vpop.permute.xlu1 %48 }
  0x87   :  { %v44_v18 = vpop.permute.xlu0 %43 }
  0x89   :  { %v54_v24 = vpop.permute.xlu1 %53 }
  0x8b   :  { %v173_v40 = vpop.permute.xlu0 %172 }
  0x8d   :  { %v178_v39 = vpop.permute.xlu1 %177 }
  0x8f   :  { %v183_v49 = vpop.permute.xlu0 %182 }
  0x91   :  { %v188_v46 = vpop.permute.xlu1 %187 }
  0x93   :  { %v297_v58 = vpop.permute.xlu0 %296 }
  0xd7   :  { %v420_v19 = vpop.f32.mrb[0].mxu0 }
  0xd8   :  { %v145_v20 = vadd.f32 %v420_v19, %v44_v18  ;;  %v139_v21 = vpop.f32.mrb[1].mxu0 }
  0xd9   :  { %v140_v22 = vadd.f32 %v139_v21, %v39_v16 }
  0xda   :  { %v159_v23 = vmax.f32 %v145_v20, 0.0 }
  0xdb   :  { %v158_v25 = vmax.f32 %v140_v22, 0.0  ;;  %v423_v26 = vpop.f32.mrb[2].mxu0 }
  0xdc   :  { %v155_v27 = vadd.f32 %v423_v26, %v54_v24  ;;  %v149_v28 = vpop.f32.mrb[3].mxu0 }
  0xdd   :  { %v150_v29 = vadd.f32 %v149_v28, %v49_v17  ;;  %v449_v30 = vpack.c.bf16 %v159_v23, %v158_v25 }
  0xde   :  { %v161_v31 = vmax.f32 %v155_v27, 0.0 }
  0xdf   :  { %v160_v32 = vmax.f32 %v150_v29, 0.0  ;;  %450 = vmatprep.subr.bf16.mxu1 %v449_v30 }
  0xe0   :  { %452 = vmatpush3.bf16.msra.mxu1 %v449_v30 }
  0xe1   :  { %v453_v33 = vpack.c.bf16 %v161_v31, %v160_v32 }
  0xe3   :  { %454 = vmatprep.subr.bf16.mxu1 %v453_v33 }
  0xe4   :  { %456 = vmatpush3.bf16.msra.mxu1 %v453_v33 }
  0xe7   :  { %433 = vmatmul.mubr.msk.f32.vlgmr.msra.gmra.mrb[0].mxu1 %vm190_vm2, %v163_v34 }
  0xe8   :  { %435 = vmatprep.mubr.msk.f32.mxu1 %vm190_vm2, %v164_v35 }
  0xeb   :  { %436 = vmatmul.mubr.msk.f32.gmra.mrb[2].mxu1 %vm190_vm2, %v165_v36 }
 0x1ba   :  { %v434_v41 = vpop.f32.mrb[0].mxu1 }
 0x1bb   :  { %v275_v42 = vadd.f32 %v434_v41, %v178_v39  ;;  %v269_v43 = vpop.f32.mrb[1].mxu1 }
 0x1bc   :  { %v270_v44 = vadd.f32 %v269_v43, %v173_v40 }
 0x1bd   :  { %v289_v45 = vmax.f32 %v275_v42, 0.0 }
 0x1be   :  { %v288_v47 = vmax.f32 %v270_v44, 0.0  ;;  %v437_v48 = vpop.f32.mrb[2].mxu1 }
 0x1bf   :  { %v285_v50 = vadd.f32 %v437_v48, %v188_v46  ;;  %v279_v51 = vpop.f32.mrb[3].mxu1 }
 0x1c0   :  { %v458_v52 = vpack.c.bf16 %v289_v45, %v288_v47  ;;  %v280_v53 = vadd.f32 %v279_v51, %v183_v49 }
 0x1c1   :  { %v291_v54 = vmax.f32 %v285_v50, 0.0 }
 0x1c2   :  { %v290_v55 = vmax.f32 %v280_v53, 0.0  ;;  %459 = vmatpush3.bf16.msra.mxu0 %v458_v52 }
 0x1c3   :  { %460 = vmatprep.subr.bf16.mxu0 %v495_v37 }
 0x1c4   :  { %v461_v56 = vpack.c.bf16 %v291_v54, %v290_v55 }
 0x1c6   :  { %462 = vmatpush3.bf16.msra.mxu0 %v461_v56 }
 0x1c9   :  { %447 = vmatmul.mubr.msk.f32.vlgmr.msra.gmra.mrb[4].mxu0 %vm190_vm2, %v292_v57 }
 0x29c   :  { %v368_v59 = vpop.f32.mrb[4].mxu0 }
 0x29d   :  { %v369_v60 = vadd.f32 %v368_v59, %v297_v58  ;;  %v448_v61 = vpop.f32.mrb[5].mxu0 }
 0x29f   :  { %373 = vst.msk [vmem:[#allocation2] sm:$0x3] %vm372_vm4, %v369_v60 }
 0x2a0   :  { %481 = shalt.err (!%p478_p4)
}
 0x2a1   :  { %s482_s13 = scalar_lea.hbm %s624_s7, 32 }
 0x2a2   :  { %p483_p5 = scmp.ne.s32.totalorder %s624_s7, %s482_s13  ;;  %p486_p6 = scmp.lt.u32.totalorder %s482_s13, %s624_s7 }
 0x2a4   :  { %p488_p7 = pnand %p486_p6, %p483_p5 }
 0x2a6   :  { %491 = shalt.err (!%p488_p7)
}
 0x2a7   :  { %383 = dma.vmem_to_hbm [thread:$0]  %s381_s0, 32, %s624_s7, [#allocation3]  }
 0x2a8   :  { %492 = dma.done.wait [#allocation3], 32  }
 0x2a9   :  { %493 = vsyncadd [#allocation3], 4294967264 }
 0x2aa   :  { %387 = vsyncpa [#allocation3], 1 }

</bundles_post_ra>
